<compile_context>
chip_gen: v6e
topology: v6e:2x2x1
jax: 0.10.0
libtpu: 0.0.40
codegen_flags: <defaults>
</compile_context>

<pallas_src>
import math

import jax
import jax.numpy as jnp
from jax.experimental import pallas as pl
from jax.experimental.pallas import tpu as pltpu

LANE = 128
TR_CAP = 1024  # row-tile target (512-2048 sweet spot); multiple of 32 -> valid for all dtypes


def _sublane_for(dtype) -> int:
    """Minimum second-to-last tile grain for a dtype (f32:8, bf16:16, int8/fp8:32)."""
    itemsize = jnp.dtype(dtype).itemsize
    if itemsize >= 4:
        return 8
    if itemsize == 2:
        return 16
    return 32


def _make_sum_kernel(n, weighted, acc_dtype):
    """Build a kernel taking n separate (TR, 128) input tiles (+ SMEM weights)."""
    if weighted:
        def kernel(w_ref, *refs):
            x_refs, o_ref = refs[:n], refs[n]
            acc = x_refs[0][...].astype(acc_dtype)
            for i in range(n - 1):               # n is small & static -> unrolled
                acc = acc + x_refs[i + 1][...].astype(acc_dtype) * w_ref[i]
            o_ref[...] = acc.astype(o_ref.dtype)
    else:
        def kernel(*refs):
            x_refs, o_ref = refs[:n], refs[n]
            acc = x_refs[0][...].astype(acc_dtype)
            for i in range(n - 1):
                acc = acc + x_refs[i + 1][...].astype(acc_dtype)
            o_ref[...] = acc.astype(o_ref.dtype)
    return kernel


class SumPallas:
    """JAX/Pallas equivalent of models/experimental.py::Sum."""

    def __init__(self, n, weight=False):
        self.n = n
        # n == 1 weighted degenerates to identity-copy => use the plain path.
        self.weight = bool(weight) and n > 1
        if weight:
            # deterministic init, identical to nn.Parameter(-torch.arange(1.0, n) / 2)
            self.w = -jnp.arange(1.0, n, dtype=jnp.float32) / 2.0

    def __call__(self, xs):
        assert len(xs) == self.n
        orig_shape = xs[0].shape
        dtype = xs[0].dtype

        total = math.prod(orig_shape)
        sublane = _sublane_for(dtype)
        itemsize = jnp.dtype(dtype).itemsize

        # --- pick the row tile TR ------------------------------------------------
        # Double-buffered inputs + output: (n + 1) * 2 * TR * 128 * itemsize bytes.
        # Keep it <= ~12 MiB so the default scoped VMEM limit (16 MiB on v5e,
        # 32 MiB on v6e/v7x) is never exceeded.
        bytes_per_row = (self.n + 1) * 2 * LANE * itemsize
        tr_budget = max(sublane, (12 * 1024 * 1024) // bytes_per_row)
        TR = min(TR_CAP, tr_budget)
        TR = max(sublane, (TR // sublane) * sublane)

        # Rows actually needed (rounded to the dtype sublane grain), then shrink
        # TR for tiny inputs and round rows up to a TR multiple so the grid has
        # no dropped remainder.
        rows_needed = -(-total // LANE)
        rows_needed = -(-rows_needed // sublane) * sublane
        TR = min(TR, rows_needed)
        rows = -(-rows_needed // TR) * TR
        padded = rows * LANE

        # --- glue: flatten to lane-dense slabs (pad only when unavoidable) -------
        flat = [jnp.reshape(x, (-1,)) for x in xs]
        if padded != total:
            flat = [jnp.pad(f, (0, padded - total)) for f in flat]
        slabs = [f.reshape(rows, LANE) for f in flat]

        grid = (rows // TR,)
        x_spec = pl.BlockSpec((TR, LANE), lambda r: (r, 0))
        o_spec = pl.BlockSpec((TR, LANE), lambda r: (r, 0))
        out_shape = jax.ShapeDtypeStruct((rows, LANE), dtype)
        cparams = pltpu.CompilerParams(dimension_semantics=("parallel",))

        acc_dtype = jnp.float32 if jnp.issubdtype(dtype, jnp.floating) else dtype
        kernel = _make_sum_kernel(self.n, self.weight, acc_dtype)

        if self.weight:
            # sigmoid(w)*2 is a tiny scalar-parameter prep (glue); the weighted
            # multiply-accumulate hot path runs inside the kernel.
            w_eff = (jax.nn.sigmoid(self.w) * 2.0).astype(jnp.float32)
            out = pl.pallas_call(
                kernel,
                out_shape=out_shape,
                grid=grid,
                in_specs=[pl.BlockSpec(memory_space=pltpu.SMEM)] + [x_spec] * self.n,
                out_specs=o_spec,
                compiler_params=cparams,
            )(w_eff, *slabs)
        else:
            out = pl.pallas_call(
                kernel,
                out_shape=out_shape,
                grid=grid,
                in_specs=[x_spec] * self.n,
                out_specs=o_spec,
                compiler_params=cparams,
            )(*slabs)

        out_flat = out.reshape(-1)
        if padded != total:
            out_flat = out_flat[:total]
        return out_flat.reshape(orig_shape)


if __name__ == "__main__":
    key = jax.random.PRNGKey(0)
    n = 3
    shape = (2, 4, 16, 16)  # NCHW, small

    keys = jax.random.split(key, n)
    xs = [jax.random.normal(k, shape, dtype=jnp.float32) for k in keys]

    # weighted variant (weight=True)
    mod_w = SumPallas(n, weight=True)
    y_w = jax.block_until_ready(mod_w(xs))

    # unweighted variant (weight=False)
    mod_p = SumPallas(n, weight=False)
    y_p = jax.block_until_ready(mod_p(xs))

    # pure-JAX reference check (matches PyTorch forward semantics)
    w_eff = jax.nn.sigmoid(-jnp.arange(1.0, n) / 2.0) * 2.0
    ref_w = xs[0]
    for i in range(n - 1):
        ref_w = ref_w + xs[i + 1] * w_eff[i]
    ref_p = xs[0]
    for i in range(n - 1):
        ref_p = ref_p + xs[i + 1]

    assert y_w.shape == shape and y_w.dtype == jnp.float32
    assert y_p.shape == shape and y_p.dtype == jnp.float32
    assert jnp.allclose(y_w, ref_w, atol=1e-5, rtol=1e-5)
    assert jnp.allclose(y_p, ref_p, atol=1e-5, rtol=1e-5)

    print("KERNEL_OK")
</pallas_src>

<mosaic_0001>
module attributes {stable_mosaic.version = 11 : i64} {
  func.func @kernel(%arg0: i32, %arg1: memref<2xf32, #tpu.memory_space<smem>>, %arg2: memref<16x128xf32, #tpu.memory_space<vmem>>, %arg3: memref<16x128xf32, #tpu.memory_space<vmem>>, %arg4: memref<16x128xf32, #tpu.memory_space<vmem>>, %arg5: memref<16x128xf32, #tpu.memory_space<vmem>>) attributes {dimension_semantics = [#tpu.dimension_semantics<parallel>], iteration_bounds = array<i64: 1>, scalar_prefetch = 0 : i64, scratch_operands = 0 : i64, tpu.core_type = #tpu.core_type<tc>, window_params = [{transform_indices = @transform_0, window_bounds = array<i64: 2>}, {transform_indices = @transform_1, window_bounds = array<i64: 16, 128>}, {transform_indices = @transform_2, window_bounds = array<i64: 16, 128>}, {transform_indices = @transform_3, window_bounds = array<i64: 16, 128>}, {transform_indices = @transform_4, window_bounds = array<i64: 16, 128>}]} {
    %c0 = arith.constant 0 : index
    %c0_0 = arith.constant 0 : index
    %0 = vector.load %arg2[%c0, %c0_0] : memref<16x128xf32, #tpu.memory_space<vmem>>, vector<16x128xf32>
    %c0_1 = arith.constant 0 : index
    %c0_2 = arith.constant 0 : index
    %1 = vector.load %arg3[%c0_1, %c0_2] : memref<16x128xf32, #tpu.memory_space<vmem>>, vector<16x128xf32>
    %c0_3 = arith.constant 0 : index
    %2 = memref.load %arg1[%c0_3] : memref<2xf32, #tpu.memory_space<smem>>
    %3 = vector.broadcast %2 : f32 to vector<16x128xf32>
    %4 = arith.mulf %1, %3 : vector<16x128xf32>
    %5 = arith.addf %0, %4 : vector<16x128xf32>
    %c0_4 = arith.constant 0 : index
    %c0_5 = arith.constant 0 : index
    %6 = vector.load %arg4[%c0_4, %c0_5] : memref<16x128xf32, #tpu.memory_space<vmem>>, vector<16x128xf32>
    %c1 = arith.constant 1 : index
    %7 = memref.load %arg1[%c1] : memref<2xf32, #tpu.memory_space<smem>>
    %8 = vector.broadcast %7 : f32 to vector<16x128xf32>
    %9 = arith.mulf %6, %8 : vector<16x128xf32>
    %10 = arith.addf %5, %9 : vector<16x128xf32>
    %c0_6 = arith.constant 0 : index
    %c0_7 = arith.constant 0 : index
    %11 = vector.load %arg5[%c0_6, %c0_7] : memref<16x128xf32, #tpu.memory_space<vmem>>, vector<16x128xf32>
    tpu.vector_store %arg5[%c0_6, %c0_7], %10 {strides = array<i32>} : memref<16x128xf32, #tpu.memory_space<vmem>>, vector<16x128xf32>,
    return
  }
  func.func @transform_0(%arg0: i32) -> i32 {
    %c0_i32 = arith.constant 0 : i32
    %c0_i32_0 = arith.constant 0 : i32
    return %c0_i32 : i32
  }
  func.func @transform_1(%arg0: i32) -> (i32, i32) {
    %c0_i32 = arith.constant 0 : i32
    %c0_i32_0 = arith.constant 0 : i32
    return %arg0, %c0_i32 : i32, i32
  }
  func.func @transform_2(%arg0: i32) -> (i32, i32) {
    %c0_i32 = arith.constant 0 : i32
    %c0_i32_0 = arith.constant 0 : i32
    return %arg0, %c0_i32 : i32, i32
  }
  func.func @transform_3(%arg0: i32) -> (i32, i32) {
    %c0_i32 = arith.constant 0 : i32
    %c0_i32_0 = arith.constant 0 : i32
    return %arg0, %c0_i32 : i32, i32
  }
  func.func @transform_4(%arg0: i32) -> (i32, i32) {
    %c0_i32 = arith.constant 0 : i32
    %c0_i32_0 = arith.constant 0 : i32
    return %arg0, %c0_i32 : i32, i32
  }
}

</mosaic_0001>

<bundles_post_ra>
// kernel: tpu_custom_call.1
= control target key start
LH: loop header
LB: loop body
LE: loop exit
PB: predicated region body
PF: predicated region fallthrough
CT: control target
= control target key end

     0   :  { %9 = vsyncpa [#allocation5], 0  ;;  %s272_s0 = inlined_call_operand.hbm [shape: f32[2], index: 0, kind: input, shape index: {}]   ;;  %s273_s1 = inlined_call_operand.hbm [shape: f32[16,128], index: 1, kind: input, shape index: {}]   ;;  %s274_s2 = inlined_call_operand.hbm [shape: f32[16,128], index: 2, kind: input, shape index: {}]   ;;  %s275_s3 = inlined_call_operand.hbm [shape: f32[16,128], index: 3, kind: input, shape index: {}]   ;;  %s276_s4 = inlined_call_operand.hbm [shape: f32[16,128], index: 4, kind: output, shape index: {}]  }
   0x1   :  { %10 = vsyncpa [#allocation3], 0 }
   0x2   :  { %11 = vsyncpa [#allocation8], 0 }
   0x3   :  { %12 = vsyncpa [#allocation4], 0  ;;  %s213_s15 = smov [#allocation7]   ;;  %s214_s17 = smov [#allocation6]  }
   0x4   :  { %s38_s16 = sshll.u32 %s213_s15, 4  ;;  %s26_s18 = sshll.u32 %s214_s17, 4  ;;  %s39_s16 = int_to_ptr.vmem [resolvable:$true] %s38_s16  ;;  %s27_s18 = int_to_ptr.vmem [resolvable:$true] %s26_s18 }
   0x5   :  { %s125_s19 = scalar_lea.vmem %s39_s16, 256  ;;  %p130_p1 = scmp.lt.s32.totalorder %s39_s16, %s39_s16 }
   0x6   :  { %p126_p0 = scmp.ne.s32.totalorder %s39_s16, %s125_s19  ;;  %p131_p2 = scmp.lt.s32.totalorder %s125_s19, %s125_s19 }
   0x8   :  { %p132_p3 = por %p131_p2, %p130_p1 }
   0xa   :  { %p133_p4 = pnand %p132_p3, %p126_p0 }
   0xc   :  { %136 = shalt.err (!%p133_p4)
}
   0xd   :  { %s215_s20 = smov 128   ;;  %s216_s21 = smov 8  }
   0xe   :  { %44 = dma.hbm_to_vmem [thread:$0]  %s274_s2, 256, %s39_s16, [#allocation8], %s215_s20, %s215_s20, %s216_s21  }
   0xf   :  { %s217_s24 = smov [#allocation2]   ;;  %s153_s27 = scalar_lea.vmem %s27_s18, 256 }
  0x10   :  { %20 = dma.hbm_to_smem %s272_s0, 16, %s217_s24, [#allocation5]  }
  0x11   :  { %p154_p5 = scmp.ne.s32.totalorder %s27_s18, %s153_s27  ;;  %p158_p6 = scmp.lt.s32.totalorder %s27_s18, %s27_s18 }
  0x12   :  { %p159_p7 = scmp.lt.s32.totalorder %s153_s27, %s153_s27 }
  0x14   :  { %p160_p8 = por %p159_p7, %p158_p6 }
  0x16   :  { %p161_p9 = pnand %p160_p8, %p154_p5 }
  0x18   :  { %164 = shalt.err (!%p161_p9)
}
  0x19   :  { %32 = dma.hbm_to_vmem [thread:$0]  %s273_s1, 256, %s27_s18, [#allocation3], %s215_s20, %s215_s20, %s216_s21  }
  0x1a   :  { %s218_s2 = smov [#allocation9]  }
  0x1b   :  { %s50_s30 = sshll.u32 %s218_s2, 4  ;;  %s51_s30 = int_to_ptr.vmem [resolvable:$true] %s50_s30 }
  0x1c   :  { %s173_s5 = scalar_lea.vmem %s51_s30, 256  ;;  %p178_p11 = scmp.lt.s32.totalorder %s51_s30, %s51_s30 }
  0x1d   :  { %p174_p10 = scmp.ne.s32.totalorder %s51_s30, %s173_s5  ;;  %p179_p12 = scmp.lt.s32.totalorder %s173_s5, %s173_s5 }
  0x1f   :  { %p180_p13 = por %p179_p12, %p178_p11 }
  0x21   :  { %p181_p0 = pnand %p180_p13, %p174_p10 }
  0x23   :  { %184 = shalt.err (!%p181_p0)
}
  0x24   :  { %56 = dma.hbm_to_vmem [thread:$0]  %s275_s3, 256, %s51_s30, [#allocation8], %s215_s20, %s215_s20, %s216_s21  }
  0x25   :  { %205 = dma.done.wait [#allocation5], 16  }
  0x26   :  { %206 = vsyncadd [#allocation5], 4294967280 }
  0x27   :  { %207 = dma.done.wait [#allocation3], 256  }
  0x28   :  { %208 = vsyncadd [#allocation3], 4294967040 }
  0x29   :  { %209 = dma.done.wait [#allocation8], 512  }
  0x2a   :  { %210 = vsyncadd [#allocation8], 4294966784 }
  0x2b   :  { %69 = sfence }
  0x2c   :  { %s74_s1 = sld [smem:[#allocation2]]  ;;  %v72_v0 = vld [vmem:[#allocation7] sm:$0xff]  ;;  %v73_v1 = vld [vmem:[#allocation7 + $0x8] sm:$0xff]  ;;  %v80_v2 = vld [vmem:[#allocation9] sm:$0xff]  ;;  %s219_s3 = smov [#allocation10]  }
  0x2d   :  { %s109_s7 = sld [smem:[#allocation2 + $0x1]]  ;;  %v81_v3 = vld [vmem:[#allocation9 + $0x8] sm:$0xff]  ;;  %v70_v4 = vld [vmem:[#allocation6] sm:$0xff]  ;;  %s95_s8 = sshll.u32 %s219_s3, 4  ;;  %s96_s8 = int_to_ptr.vmem [resolvable:$true] %s95_s8 }
  0x2e   :  { %v71_v6 = vld [vmem:[#allocation6 + $0x8] sm:$0xff]  ;;  %s185_s9 = scalar_lea.vmem %s96_s8, 256  ;;  %p190_p2 = scmp.lt.s32.totalorder %s96_s8, %s96_s8 }
  0x2f   :  { %p186_p1 = scmp.ne.s32.totalorder %s96_s8, %s185_s9  ;;  %p191_p3 = scmp.lt.s32.totalorder %s185_s9, %s185_s9 }
  0x31   :  { %p192_p4 = por %p191_p3, %p190_p2 }
  0x32   :  { %v75_v5 = vstv %s74_s1 }
  0x33   :  { %v76_v7 = vmul.f32 %v75_v5, %v72_v0  ;;  %v83_v8 = vstv %s109_s7  ;;  %v77_v9 = vmul.f32 %v75_v5, %v73_v1  ;;  %p193_p5 = pnand %p192_p4, %p186_p1 }
  0x34   :  { %v84_v10 = vmul.f32 %v83_v8, %v80_v2  ;;  %v85_v11 = vmul.f32 %v83_v8, %v81_v3 }
  0x35   :  { %v78_v12 = vadd.f32 %v76_v7, %v70_v4  ;;  %v79_v13 = vadd.f32 %v77_v9, %v71_v6 }
  0x37   :  { %v86_v14 = vadd.f32 %v84_v10, %v78_v12  ;;  %v87_v15 = vadd.f32 %v85_v11, %v79_v13 }
  0x39   :  { %88 = vst [vmem:[#allocation10] sm:$0xff] %v86_v14  ;;  %89 = vst [vmem:[#allocation10 + $0x8] sm:$0xff] %v87_v15 }
  0x3a   :  { %196 = shalt.err (!%p193_p5)
}
  0x3b   :  { %101 = dma.vmem_to_hbm [thread:$0]  %s96_s8, 256, %s276_s4, [#allocation4], %s215_s20, %s215_s20, %s216_s21  }
  0x3c   :  { %211 = dma.done.wait [#allocation4], 256  }
  0x3d   :  { %212 = vsyncadd [#allocation4], 4294967040 }
  0x3e   :  { %105 = vsyncpa [#allocation3], 1 }
  0x3f   :  { %106 = vsyncpa [#allocation8], 1 }
  0x40   :  { %107 = vsyncpa [#allocation4], 1 }
  0x41   :  { %108 = vsyncpa [#allocation5], 1 }

</bundles_post_ra>
